<compile_context>
chip_gen: v7x
topology: tpu7x:2x2x1
jax: 0.10.0
libtpu: 0.0.40
codegen_flags: <defaults>
</compile_context>

<pallas_src>
import jax
import jax.numpy as jnp
from jax.experimental import pallas as pl
from jax.experimental.pallas import tpu as pltpu

IMG_HEIGHT = 28
IMG_WIDTH = 28
IN_FEATURES = IMG_HEIGHT * IMG_WIDTH   # 784
HIDDEN = 64
CLASSES = 10
OUT_PAD = 128                          # lane-dense padded logits width
DEFAULT_TB = 1024                      # default batch tile (rows per grid step)


def _mlp3_kernel(x_ref, w1_ref, b1_ref, w2_ref, b2_ref, w3_ref, b3_ref, o_ref):
    # x arrives as f32 (single HBM read); cast to bf16 on the VPU right before the MXU.
    xb = x_ref[...].astype(jnp.bfloat16)
    # Layer 1: bf16 x bf16 -> f32 accumulate on the MXU; bias + ReLU in f32 on the VPU.
    h1 = jnp.dot(xb, w1_ref[...], preferred_element_type=jnp.float32)
    h1 = jnp.maximum(h1 + b1_ref[...], 0.0)
    # Layer 2
    h2 = jnp.dot(h1.astype(jnp.bfloat16), w2_ref[...], preferred_element_type=jnp.float32)
    h2 = jnp.maximum(h2 + b2_ref[...], 0.0)
    # Layer 3 (logits); output block is 128 lanes wide (cols >= CLASSES are exact zeros).
    logits = jnp.dot(h2.astype(jnp.bfloat16), w3_ref[...], preferred_element_type=jnp.float32)
    o_ref[...] = (logits + b3_ref[...]).astype(o_ref.dtype)


def _round_up(n, m):
    return ((n + m - 1) // m) * m


def dense3_forward(x_nchw, params, *, batch_tile=DEFAULT_TB,
                   out_dtype=jnp.bfloat16, core_parallel=False):
    """x_nchw: [B, 1, 28, 28] float32. Returns logits [B, CLASSES] (out_dtype).

    Set core_parallel=True on v7x to shard the batch grid across both TensorCores.
    """
    w1, b1, w2, b2, w3, b3 = params
    B = x_nchw.shape[0]

    # nn.Flatten(): row-major [B,1,28,28] -> [B,784] is a free bitcast; keep f32 in HBM.
    x = x_nchw.reshape(B, IN_FEATURES)

    # Batch tile: 16-aligned (bf16 output sublane packing), clamped for small B.
    tb = min(_round_up(batch_tile, 16), _round_up(B, 16))
    grid_b = pl.cdiv(B, tb)
    out_rows = grid_b * tb   # over-allocate output so every output block is full/unmasked

    # bf16 MXU weight operands; f32 biases; pad logits lane dim to 128 with zeros.
    w1b = w1.astype(jnp.bfloat16)
    w2b = w2.astype(jnp.bfloat16)
    w3b = jnp.pad(w3, ((0, 0), (0, OUT_PAD - CLASSES))).astype(jnp.bfloat16)
    b1f = b1.astype(jnp.float32)
    b2f = b2.astype(jnp.float32)
    b3p = jnp.pad(b3, ((0, 0), (0, OUT_PAD - CLASSES))).astype(jnp.float32)

    # VMEM-resident operands: constant block index across the batch grid (fetched once).
    def resident(arr):
        n = arr.ndim
        return pl.BlockSpec(arr.shape, lambda i, n=n: (0,) * n)

    dim_sem = (pltpu.CORE_PARALLEL,) if core_parallel else ("parallel",)

    out = pl.pallas_call(
        _mlp3_kernel,
        out_shape=jax.ShapeDtypeStruct((out_rows, OUT_PAD), out_dtype),
        grid_spec=pltpu.PrefetchScalarGridSpec(
            num_scalar_prefetch=0,
            grid=(grid_b,),
            in_specs=[
                pl.BlockSpec((tb, IN_FEATURES), lambda i: (i, 0)),   # streamed f32 x tile
                resident(w1b), resident(b1f),
                resident(w2b), resident(b2f),
                resident(w3b), resident(b3p),
            ],
            out_specs=pl.BlockSpec((tb, OUT_PAD), lambda i: (i, 0)),
        ),
        compiler_params=pltpu.CompilerParams(
            dimension_semantics=dim_sem,
            vmem_limit_bytes=32 * 1024 * 1024,   # headroom on v5e's 16 MiB scoped default
        ),
    )(x, w1b, b1f, w2b, b2f, w3b, b3p)

    # TODO(synk): in a real pipeline, consume the padded (out_rows, 128) buffer directly
    # (fuse loss/argmax) instead of materializing this [B, 10] slice (one extra HBM pass).
    return out[:B, :CLASSES]


def init_params(key):
    """Deterministic init mimicking nn.Linear default: U(-1/sqrt(fan_in), 1/sqrt(fan_in)).
    Weights stored as [in_features, out_features] (transposed vs. PyTorch) so y = x @ W + b."""
    ks = jax.random.split(key, 6)

    def linear(kw, kb, fan_in, fan_out):
        bound = 1.0 / jnp.sqrt(jnp.float32(fan_in))
        w = jax.random.uniform(kw, (fan_in, fan_out), jnp.float32, -bound, bound)
        b = jax.random.uniform(kb, (1, fan_out), jnp.float32, -bound, bound)
        return w, b

    w1, b1 = linear(ks[0], ks[1], IN_FEATURES, HIDDEN)
    w2, b2 = linear(ks[2], ks[3], HIDDEN, HIDDEN)
    w3, b3 = linear(ks[4], ks[5], HIDDEN, CLASSES)
    return (w1, b1, w2, b2, w3, b3)


def _reference(x_nchw, params):
    """Pure-JAX reference with the same bf16-operand / f32-accumulate numerics."""
    w1, b1, w2, b2, w3, b3 = params
    xf = x_nchw.reshape(x_nchw.shape[0], -1).astype(jnp.bfloat16)
    h1 = jnp.dot(xf, w1.astype(jnp.bfloat16), preferred_element_type=jnp.float32) + b1
    h1 = jnp.maximum(h1, 0.0)
    h2 = jnp.dot(h1.astype(jnp.bfloat16), w2.astype(jnp.bfloat16),
                 preferred_element_type=jnp.float32) + b2
    h2 = jnp.maximum(h2, 0.0)
    return jnp.dot(h2.astype(jnp.bfloat16), w3.astype(jnp.bfloat16),
                   preferred_element_type=jnp.float32) + b3


if __name__ == "__main__":
    key = jax.random.PRNGKey(0)
    k_params, k_x1, k_x2 = jax.random.split(key, 3)
    params = init_params(k_params)

    # Test 1: MNIST-shaped batch [16, 1, 28, 28] -> single grid step, exact tile.
    B1 = 16
    x1 = jax.random.normal(k_x1, (B1, 1, IMG_HEIGHT, IMG_WIDTH), jnp.float32)
    logits1 = dense3_forward(x1, params)
    jax.block_until_ready(logits1)
    assert logits1.shape == (B1, CLASSES)
    assert jnp.allclose(logits1.astype(jnp.float32), _reference(x1, params),
                        atol=1e-2, rtol=1e-2)

    # Test 2: multi-step batch grid with a ragged last x tile (B=20, tile=16, no host pad).
    B2 = 20
    x2 = jax.random.normal(k_x2, (B2, 1, IMG_HEIGHT, IMG_WIDTH), jnp.float32)
    logits2 = dense3_forward(x2, params, batch_tile=16)
    jax.block_until_ready(logits2)
    assert logits2.shape == (B2, CLASSES)
    assert jnp.allclose(logits2.astype(jnp.float32), _reference(x2, params),
                        atol=1e-2, rtol=1e-2)

    print("KERNEL_OK")
</pallas_src>

<mosaic_0001>
module attributes {stable_mosaic.version = 11 : i64} {
  func.func @_mlp3_kernel(%arg0: i32, %arg1: memref<16x784xf32, #tpu.memory_space<vmem>>, %arg2: memref<784x64xbf16, #tpu.memory_space<vmem>>, %arg3: memref<1x64xf32, #tpu.memory_space<vmem>>, %arg4: memref<64x64xbf16, #tpu.memory_space<vmem>>, %arg5: memref<1x64xf32, #tpu.memory_space<vmem>>, %arg6: memref<64x128xbf16, #tpu.memory_space<vmem>>, %arg7: memref<1x128xf32, #tpu.memory_space<vmem>>, %arg8: memref<16x128xbf16, #tpu.memory_space<vmem>>) attributes {dimension_semantics = [#tpu.dimension_semantics<parallel>], iteration_bounds = array<i64: 1>, scalar_prefetch = 0 : i64, scratch_operands = 0 : i64, tpu.core_type = #tpu.core_type<tc>, window_params = [{transform_indices = @transform_0, window_bounds = array<i64: 16, 784>}, {pipeline_mode = #tpu.pipeline_mode<synchronous>, transform_indices = @transform_1, window_bounds = array<i64: 784, 64>}, {pipeline_mode = #tpu.pipeline_mode<synchronous>, transform_indices = @transform_2, window_bounds = array<i64: 1, 64>}, {pipeline_mode = #tpu.pipeline_mode<synchronous>, transform_indices = @transform_3, window_bounds = array<i64: 64, 64>}, {pipeline_mode = #tpu.pipeline_mode<synchronous>, transform_indices = @transform_4, window_bounds = array<i64: 1, 64>}, {pipeline_mode = #tpu.pipeline_mode<synchronous>, transform_indices = @transform_5, window_bounds = array<i64: 64, 128>}, {pipeline_mode = #tpu.pipeline_mode<synchronous>, transform_indices = @transform_6, window_bounds = array<i64: 1, 128>}, {transform_indices = @transform_7, window_bounds = array<i64: 16, 128>}]} {
    %c0 = arith.constant 0 : index
    %c0_0 = arith.constant 0 : index
    %0 = vector.load %arg1[%c0, %c0_0] : memref<16x784xf32, #tpu.memory_space<vmem>>, vector<16x784xf32>
    %1 = arith.truncf %0 : vector<16x784xf32> to vector<16x784xbf16>
    %c0_1 = arith.constant 0 : index
    %c0_2 = arith.constant 0 : index
    %2 = vector.load %arg2[%c0_1, %c0_2] : memref<784x64xbf16, #tpu.memory_space<vmem>>, vector<784x64xbf16>
    %cst = arith.constant dense<0.000000e+00> : vector<16x64xf32>
    %3 = tpu.matmul %1, %2, %cst {dimension_numbers = #tpu.dot_dimension_numbers<[1], [0], [0], [1], [0, 0, 1, 1], [], []>} : vector<16x784xbf16>, vector<784x64xbf16>, vector<16x64xf32> -> vector<16x64xf32>
    %c0_3 = arith.constant 0 : index
    %c0_4 = arith.constant 0 : index
    %4 = vector.load %arg3[%c0_3, %c0_4] : memref<1x64xf32, #tpu.memory_space<vmem>>, vector<1x64xf32>
    %5 = vector.broadcast %4 : vector<1x64xf32> to vector<16x64xf32>
    %6 = arith.addf %3, %5 : vector<16x64xf32>
    %cst_5 = arith.constant 0.000000e+00 : f32
    %7 = vector.broadcast %cst_5 : f32 to vector<16x64xf32>
    %8 = arith.maximumf %6, %7 : vector<16x64xf32>
    %9 = arith.truncf %8 : vector<16x64xf32> to vector<16x64xbf16>
    %c0_6 = arith.constant 0 : index
    %c0_7 = arith.constant 0 : index
    %10 = vector.load %arg4[%c0_6, %c0_7] : memref<64x64xbf16, #tpu.memory_space<vmem>>, vector<64x64xbf16>
    %cst_8 = arith.constant dense<0.000000e+00> : vector<16x64xf32>
    %11 = tpu.matmul %9, %10, %cst_8 {dimension_numbers = #tpu.dot_dimension_numbers<[1], [0], [0], [1], [0, 0, 1, 1], [], []>} : vector<16x64xbf16>, vector<64x64xbf16>, vector<16x64xf32> -> vector<16x64xf32>
    %c0_9 = arith.constant 0 : index
    %c0_10 = arith.constant 0 : index
    %12 = vector.load %arg5[%c0_9, %c0_10] : memref<1x64xf32, #tpu.memory_space<vmem>>, vector<1x64xf32>
    %13 = vector.broadcast %12 : vector<1x64xf32> to vector<16x64xf32>
    %14 = arith.addf %11, %13 : vector<16x64xf32>
    %cst_11 = arith.constant 0.000000e+00 : f32
    %15 = vector.broadcast %cst_11 : f32 to vector<16x64xf32>
    %16 = arith.maximumf %14, %15 : vector<16x64xf32>
    %17 = arith.truncf %16 : vector<16x64xf32> to vector<16x64xbf16>
    %c0_12 = arith.constant 0 : index
    %c0_13 = arith.constant 0 : index
    %18 = vector.load %arg6[%c0_12, %c0_13] : memref<64x128xbf16, #tpu.memory_space<vmem>>, vector<64x128xbf16>
    %cst_14 = arith.constant dense<0.000000e+00> : vector<16x128xf32>
    %19 = tpu.matmul %17, %18, %cst_14 {dimension_numbers = #tpu.dot_dimension_numbers<[1], [0], [0], [1], [0, 0, 1, 1], [], []>} : vector<16x64xbf16>, vector<64x128xbf16>, vector<16x128xf32> -> vector<16x128xf32>
    %c0_15 = arith.constant 0 : index
    %c0_16 = arith.constant 0 : index
    %20 = vector.load %arg7[%c0_15, %c0_16] : memref<1x128xf32, #tpu.memory_space<vmem>>, vector<1x128xf32>
    %21 = vector.broadcast %20 : vector<1x128xf32> to vector<16x128xf32>
    %22 = arith.addf %19, %21 : vector<16x128xf32>
    %23 = arith.truncf %22 : vector<16x128xf32> to vector<16x128xbf16>
    %c0_17 = arith.constant 0 : index
    %c0_18 = arith.constant 0 : index
    %24 = vector.load %arg8[%c0_17, %c0_18] : memref<16x128xbf16, #tpu.memory_space<vmem>>, vector<16x128xbf16>
    tpu.vector_store %arg8[%c0_17, %c0_18], %23 {strides = array<i32>} : memref<16x128xbf16, #tpu.memory_space<vmem>>, vector<16x128xbf16>,
    return
  }
  func.func @transform_0(%arg0: i32) -> (i32, i32) {
    %c0_i32 = arith.constant 0 : i32
    %c0_i32_0 = arith.constant 0 : i32
    return %arg0, %c0_i32 : i32, i32
  }
  func.func @transform_1(%arg0: i32) -> (i32, i32) {
    %c0_i32 = arith.constant 0 : i32
    %c0_i32_0 = arith.constant 0 : i32
    %c0_i32_1 = arith.constant 0 : i32
    return %c0_i32, %c0_i32_0 : i32, i32
  }
  func.func @transform_2(%arg0: i32) -> (i32, i32) {
    %c0_i32 = arith.constant 0 : i32
    %c0_i32_0 = arith.constant 0 : i32
    %c0_i32_1 = arith.constant 0 : i32
    return %c0_i32, %c0_i32_0 : i32, i32
  }
  func.func @transform_3(%arg0: i32) -> (i32, i32) {
    %c0_i32 = arith.constant 0 : i32
    %c0_i32_0 = arith.constant 0 : i32
    %c0_i32_1 = arith.constant 0 : i32
    return %c0_i32, %c0_i32_0 : i32, i32
  }
  func.func @transform_4(%arg0: i32) -> (i32, i32) {
    %c0_i32 = arith.constant 0 : i32
    %c0_i32_0 = arith.constant 0 : i32
    %c0_i32_1 = arith.constant 0 : i32
    return %c0_i32, %c0_i32_0 : i32, i32
  }
  func.func @transform_5(%arg0: i32) -> (i32, i32) {
    %c0_i32 = arith.constant 0 : i32
    %c0_i32_0 = arith.constant 0 : i32
    %c0_i32_1 = arith.constant 0 : i32
    return %c0_i32, %c0_i32_0 : i32, i32
  }
  func.func @transform_6(%arg0: i32) -> (i32, i32) {
    %c0_i32 = arith.constant 0 : i32
    %c0_i32_0 = arith.constant 0 : i32
    %c0_i32_1 = arith.constant 0 : i32
    return %c0_i32, %c0_i32_0 : i32, i32
  }
  func.func @transform_7(%arg0: i32) -> (i32, i32) {
    %c0_i32 = arith.constant 0 : i32
    %c0_i32_0 = arith.constant 0 : i32
    return %arg0, %c0_i32 : i32, i32
  }
}

</mosaic_0001>

<bundles_post_ra>
// kernel: tpu_custom_call.1
= control target key start
LH: loop header
LB: loop body
LE: loop exit
PB: predicated region body
PF: predicated region fallthrough
CT: control target
= control target key end

     0   :  { %v1081_v43 = vmov 0.0   ;;  %vm1082_vm0 = vmmov 0   ;;  %vm448_vm1 = vcmask 130048   ;;  %s1377_s0 = inlined_call_operand.vmem [shape: f32[16,784], index: 0, kind: input, shape index: {}]   ;;  %s1378_s1 = inlined_call_operand.vmem [shape: bf16[784,64], index: 1, kind: input, shape index: {}]   ;;  %s1379_s2 = inlined_call_operand.vmem [shape: f32[1,64], index: 2, kind: input, shape index: {}]   ;;  %s1380_s3 = inlined_call_operand.vmem [shape: bf16[64,64], index: 3, kind: input, shape index: {}]   ;;  %s1381_s4 = inlined_call_operand.vmem [shape: f32[1,64], index: 4, kind: input, shape index: {}]   ;;  %s1382_s5 = inlined_call_operand.vmem [shape: bf16[64,128], index: 5, kind: input, shape index: {}]   ;;  %s1383_s6 = inlined_call_operand.vmem [shape: f32[1,128], index: 6, kind: input, shape index: {}]   ;;  %s1384_s7 = inlined_call_operand.hbm [shape: bf16[16,128], index: 7, kind: output, shape index: {}]  }
   0x1   :  { %v1000_v0 = vld [vmem:[%s1378_s1 + $0x40] sm:$0xff]   ;;  %v1004_v4 = vld [vmem:[%s1378_s1 + $0x48] sm:$0xff]   ;;  %v1008_v8 = vld [vmem:[%s1378_s1 + $0x50] sm:$0xff]  }
   0x2   :  { %v1001_v1 = vld [vmem:[%s1378_s1] sm:$0xff]   ;;  %887 = vmatprep.subr.bf16.mxu0 %v1000_v0  ;;  %v1005_v5 = vld [vmem:[%s1378_s1 + $0x8] sm:$0xff]   ;;  %v1009_v9 = vld [vmem:[%s1378_s1 + $0x10] sm:$0xff]  }
   0x3   :  { %v1002_v2 = vld [vmem:[%s1378_s1 + $0xc0] sm:$0xff]   ;;  %888 = vmatpush3.bf16.msra.mxu0 %v1001_v1  ;;  %v1006_v6 = vld [vmem:[%s1378_s1 + $0xc8] sm:$0xff]   ;;  %v1010_v10 = vld [vmem:[%s1378_s1 + $0xd0] sm:$0xff]  }
   0x4   :  { %v1003_v3 = vld [vmem:[%s1378_s1 + $0x80] sm:$0xff]   ;;  %909 = vmatprep.subr.bf16.mxu1 %v1002_v2  ;;  %889 = vmatprep.subr.bf16.mxu0 %v1004_v4  ;;  %v1007_v7 = vld [vmem:[%s1378_s1 + $0x88] sm:$0xff]   ;;  %v1011_v11 = vld [vmem:[%s1378_s1 + $0x90] sm:$0xff]  }
   0x5   :  { %910 = vmatpush3.bf16.msra.mxu1 %v1003_v3  ;;  %v1012_v12 = vld [vmem:[%s1378_s1 + $0x58] sm:$0xff]   ;;  %v1016_v16 = vld [vmem:[%s1378_s1 + $0x60] sm:$0xff]   ;;  %v1020_v20 = vld [vmem:[%s1378_s1 + $0x68] sm:$0xff]  }
   0x6   :  { %911 = vmatprep.subr.bf16.mxu1 %v1006_v6  ;;  %v1013_v13 = vld [vmem:[%s1378_s1 + $0x18] sm:$0xff]   ;;  %v1017_v17 = vld [vmem:[%s1378_s1 + $0x20] sm:$0xff]   ;;  %v1021_v21 = vld [vmem:[%s1378_s1 + $0x28] sm:$0xff]  }
   0x7   :  { %890 = vmatpush3.bf16.msra.mxu0 %v1005_v5  ;;  %v1014_v14 = vld [vmem:[%s1378_s1 + $0xd8] sm:$0xff]   ;;  %v1018_v18 = vld [vmem:[%s1378_s1 + $0xe0] sm:$0xff]   ;;  %v1022_v22 = vld [vmem:[%s1378_s1 + $0xe8] sm:$0xff]  }
   0x8   :  { %891 = vmatprep.subr.bf16.mxu0 %v1008_v8  ;;  %v1015_v15 = vld [vmem:[%s1378_s1 + $0x98] sm:$0xff]   ;;  %v1019_v19 = vld [vmem:[%s1378_s1 + $0xa0] sm:$0xff]   ;;  %v1023_v23 = vld [vmem:[%s1378_s1 + $0xa8] sm:$0xff]  }
   0x9   :  { %912 = vmatpush3.bf16.msra.mxu1 %v1007_v7  ;;  %v1024_v24 = vld [vmem:[%s1378_s1 + $0x70] sm:$0xff]   ;;  %v1028_v28 = vld [vmem:[%s1378_s1 + $0x78] sm:$0xff]   ;;  %v29_v31 = vld [vmem:[%s1377_s0 + $0x8] sm:$0xff] }
   0xa   :  { %913 = vmatprep.subr.bf16.mxu1 %v1010_v10  ;;  %v1025_v25 = vld [vmem:[%s1378_s1 + $0x30] sm:$0xff]   ;;  %v1029_v29 = vld [vmem:[%s1378_s1 + $0x38] sm:$0xff]   ;;  %v36_v32 = vld [vmem:[%s1377_s0 + $0x40] sm:$0xff] }
   0xb   :  { %892 = vmatpush3.bf16.msra.mxu0 %v1009_v9  ;;  %v1026_v26 = vld [vmem:[%s1378_s1 + $0xf0] sm:$0xff]   ;;  %v1030_v30 = vld [vmem:[%s1378_s1 + $0xf8] sm:$0xff]   ;;  %v43_v33 = vpack.c.bf16 %v36_v32, %v29_v31  ;;  %v28_v35 = vld [vmem:[%s1377_s0] sm:$0xff] }
   0xc   :  { %893 = vmatprep.subr.bf16.mxu0 %v1012_v12  ;;  %v1027_v27 = vld [vmem:[%s1378_s1 + $0xb0] sm:$0xff]   ;;  %v1031_v34 = vld [vmem:[%s1378_s1 + $0xb8] sm:$0xff]   ;;  %v1032_v38 = vld [vmem:[%s1378_s1 + $0x140] sm:$0xff]  }
   0xd   :  { %914 = vmatpush3.bf16.msra.mxu1 %v1011_v11  ;;  %v35_v36 = vld [vmem:[%s1377_s0 + $0x38] sm:$0xff]  ;;  %484 = vmatprep.mubr.bf16.mxu0 %v43_v33  ;;  %v38_v40 = vld [vmem:[%s1377_s0 + $0x50] sm:$0xff]  ;;  %v1033_v42 = vld [vmem:[%s1378_s1 + $0x100] sm:$0xff]  }
   0xe   :  { %915 = vmatprep.subr.bf16.mxu1 %v1014_v14  ;;  %v42_v37 = vpack.c.bf16 %v35_v36, %v28_v35  ;;  %v31_v39 = vld [vmem:[%s1377_s0 + $0x18] sm:$0xff]  ;;  %v30_v44 = vld [vmem:[%s1377_s0 + $0x10] sm:$0xff]  ;;  %v37_v45 = vld [vmem:[%s1377_s0 + $0x48] sm:$0xff] }
   0xf   :  { %894 = vmatpush3.bf16.msra.mxu0 %v1013_v13  ;;  %v45_v41 = vpack.c.bf16 %v38_v40, %v31_v39  ;;  %v44_v46 = vpack.c.bf16 %v37_v45, %v30_v44  ;;  %v1034_v47 = vld [vmem:[%s1378_s1 + $0x148] sm:$0xff]   ;;  %v1036_v49 = vld [vmem:[%s1378_s1 + $0x150] sm:$0xff]   ;;  %v1038_v51 = vld [vmem:[%s1378_s1 + $0x158] sm:$0xff]  }
  0x10   :  { %895 = vmatprep.subr.bf16.mxu0 %v1016_v16  ;;  %v1035_v48 = vld [vmem:[%s1378_s1 + $0x108] sm:$0xff]   ;;  %v1037_v50 = vld [vmem:[%s1378_s1 + $0x110] sm:$0xff]   ;;  %v1039_v52 = vld [vmem:[%s1378_s1 + $0x118] sm:$0xff]  }
  0x11   :  { %916 = vmatpush3.bf16.msra.mxu1 %v1015_v15  ;;  %525 = vmatprep.mubr.bf16.mxu1 %v45_v41  ;;  %v1040_v53 = vld [vmem:[%s1378_s1 + $0x160] sm:$0xff]   ;;  %v1042_v55 = vld [vmem:[%s1378_s1 + $0x168] sm:$0xff]   ;;  %v1044_v59 = vld [vmem:[%s1378_s1 + $0x170] sm:$0xff]  }
  0x12   :  { %917 = vmatprep.subr.bf16.mxu1 %v1018_v18  ;;  %v1041_v54 = vld [vmem:[%s1378_s1 + $0x120] sm:$0xff]   ;;  %v33_v57 = vld [vmem:[%s1377_s0 + $0x28] sm:$0xff]  ;;  %v34_v62 = vld [vmem:[%s1377_s0 + $0x30] sm:$0xff] }
  0x13   :  { %896 = vmatpush3.bf16.msra.mxu0 %v1017_v17  ;;  %v1048_v56 = vld [vmem:[%s1378_s1 + $0x180] sm:$0xff]   ;;  %v1043_v58 = vld [vmem:[%s1378_s1 + $0x128] sm:$0xff]   ;;  %v1045_v1 = vld [vmem:[%s1378_s1 + $0x130] sm:$0xff]  }
  0x14   :  { %897 = vmatprep.subr.bf16.mxu0 %v1020_v20  ;;  %v40_v60 = vld [vmem:[%s1377_s0 + $0x60] sm:$0xff]  ;;  %v41_v63 = vld [vmem:[%s1377_s0 + $0x68] sm:$0xff]  ;;  %v1046_v2 = vld [vmem:[%s1378_s1 + $0x178] sm:$0xff]  }
  0x15   :  { %918 = vmatpush3.bf16.msra.mxu1 %v1019_v19  ;;  %v47_v61 = vpack.c.bf16 %v40_v60, %v33_v57  ;;  %v48_v0 = vpack.c.bf16 %v41_v63, %v34_v62 }
  0x16   :  { %919 = vmatprep.subr.bf16.mxu1 %v1022_v22 }
  0x17   :  { %898 = vmatpush3.bf16.msra.mxu0 %v1021_v21 }
  0x18   :  { %899 = vmatprep.subr.bf16.mxu0 %v1024_v24 }
  0x19   :  { %920 = vmatpush3.bf16.msra.mxu1 %v1023_v23 }
  0x1a   :  { %921 = vmatprep.subr.bf16.mxu1 %v1026_v26 }
  0x1b   :  { %900 = vmatpush3.bf16.msra.mxu0 %v1025_v25 }
  0x1c   :  { %901 = vmatprep.subr.bf16.mxu0 %v1028_v28 }
  0x1d   :  { %922 = vmatpush3.bf16.msra.mxu1 %v1027_v27 }
  0x1e   :  { %923 = vmatprep.subr.bf16.mxu1 %v1030_v30 }
  0x1f   :  { %902 = vmatpush3.bf16.msra.mxu0 %v1029_v29 }
  0x20   :  { %931 = vmatprep.subr.bf16.mxu0 %v1032_v38 }
  0x21   :  { %924 = vmatpush3.bf16.msra.mxu1 %v1031_v34 }
  0x22   :  { %965 = vmatprep.subr.bf16.mxu1 %v1081_v43  ;;  %485 = vmatmul.mubr.bf16.vlgmr.msra.gmra.mrb[0].mxu0 %v42_v37 }
  0x23   :  { %932 = vmatpush3.bf16.msra.mxu0 %v1033_v42  ;;  %566 = vmatprep.mubr.bf16.mxu0 %v47_v61 }
  0x24   :  { %526 = vmatmul.mubr.bf16.vlgmr.msra.gmra.mrb[0].mxu1 %v44_v46  ;;  %933 = vmatprep.subr.bf16.mxu0 %v1034_v47 }
  0x25   :  { %967 = vmatprep.mubr.msk.bf16.mxu1 %vm1082_vm0, %v1081_v43  ;;  %966 = vmatpush3.bf16.msra.mxu1 %v1048_v56 }
  0x26   :  { %971 = vmatprep.subr.bf16.mxu1 %v1081_v43 }
  0x27   :  { %934 = vmatpush3.bf16.msra.mxu0 %v1035_v48 }
  0x28   :  { %935 = vmatprep.subr.bf16.mxu0 %v1036_v49 }
  0x2b   :  { %936 = vmatpush3.bf16.msra.mxu0 %v1037_v50 }
  0x2c   :  { %937 = vmatprep.subr.bf16.mxu0 %v1038_v51  ;;  %968 = vmatmul.mubr.msk.bf16.vlgmr.msra.gmra.mrb[4].mxu1 %vm448_vm1, %v48_v0 }
  0x2d   :  { %979 = vmatprep.mubr.msk.bf16.mxu1 %vm1082_vm0, %v1081_v43 }
  0x2f   :  { %938 = vmatpush3.bf16.msra.mxu0 %v1039_v52 }
  0x30   :  { %939 = vmatprep.subr.bf16.mxu0 %v1040_v53 }
  0x33   :  { %940 = vmatpush3.bf16.msra.mxu0 %v1041_v54 }
  0x34   :  { %941 = vmatprep.subr.bf16.mxu0 %v1042_v55 }
  0x37   :  { %942 = vmatpush3.bf16.msra.mxu0 %v1043_v58 }
  0x38   :  { %943 = vmatprep.subr.bf16.mxu0 %v1044_v59 }
  0x39   :  { %12 = vsyncpa [#allocation3], 0  ;;  %v1047_v3 = vld [vmem:[%s1378_s1 + $0x138] sm:$0xff]   ;;  %v32_v4 = vld [vmem:[%s1377_s0 + $0x20] sm:$0xff]  ;;  %vm658_vm2 = vcmask 523264  }
  0x3a   :  { %v39_v5 = vld [vmem:[%s1377_s0 + $0x58] sm:$0xff]  ;;  %v1049_v7 = vld [vmem:[%s1380_s3] sm:$0xff]   ;;  %v1050_v8 = vld [vmem:[%s1380_s3 + $0x8] sm:$0xff]  }
  0x3b   :  { %944 = vmatpush3.bf16.msra.mxu0 %v1045_v1  ;;  %v46_v6 = vpack.c.bf16 %v39_v5, %v32_v4  ;;  %972 = vmatpush3.bf16.msra.mxu1 %v1049_v7  ;;  %v1051_v9 = vld [vmem:[%s1380_s3 + $0x10] sm:$0xff]   ;;  %v1052_v10 = vld [vmem:[%s1380_s3 + $0x18] sm:$0xff]   ;;  %v815_v12 = vld [vmem:[%s1379_s2] ss:$0 sm:$0xff] }
  0x3c   :  { %945 = vmatprep.subr.bf16.mxu0 %v1046_v2  ;;  %973 = vmatprep.subr.bf16.mxu1 %v1081_v43  ;;  %v1053_v45 = vld [vmem:[%s1382_s5] sm:$0xff]   ;;  %v1054_v47 = vld [vmem:[%s1382_s5 + $0x8] sm:$0xff]   ;;  %v1055_v48 = vld [vmem:[%s1382_s5 + $0x10] sm:$0xff]  }
  0x3d   :  { %v1056_v49 = vld [vmem:[%s1382_s5 + $0x18] sm:$0xff]   ;;  %v866_v50 = vld [vmem:[%s1381_s4] ss:$0 sm:$0xff]  ;;  %s1083_s5 = smov [#allocation2]  }
  0x3e   :  { %s804_s4 = sshll.u32 %s1083_s5, 4  ;;  %s805_s4 = int_to_ptr.vmem [resolvable:$true] %s804_s4 }
  0x3f   :  { %946 = vmatpush3.bf16.msra.mxu0 %v1047_v3  ;;  %974 = vmatpush3.bf16.msra.mxu1 %v1050_v8  ;;  %s1057_s30 = scalar_lea.vmem %s805_s4, 128  ;;  %p1062_p1 = scmp.lt.s32.totalorder %s805_s4, %s805_s4 }
  0x40   :  { %975 = vmatprep.subr.bf16.mxu1 %v1081_v43  ;;  %p1058_p0 = scmp.ne.s32.totalorder %s805_s4, %s1057_s30  ;;  %p1063_p2 = scmp.lt.s32.totalorder %s1057_s30, %s1057_s30 }
  0x42   :  { %567 = vmatmul.mubr.bf16.vlgmr.msra.gmra.mrb[4].mxu0 %v46_v6  ;;  %p1064_p3 = por %p1063_p2, %p1062_p1 }
  0x43   :  { %976 = vmatpush3.bf16.msra.mxu1 %v1051_v9 }
  0x44   :  { %977 = vmatprep.subr.bf16.mxu1 %v1081_v43  ;;  %p1065_p4 = pnand %p1064_p3, %p1058_p0 }
  0x47   :  { %978 = vmatpush3.bf16.msra.mxu1 %v1052_v10 }
  0x48   :  { %983 = vmatprep.subr.bf16.mxu1 %v1081_v43 }
  0xf5   :  { %v903_v11 = vpop.f32.mrb[0].mxu0 }
  0xf6   :  { %v904_v13 = vpop.f32.mrb[1].mxu0 }
  0xf7   :  { %v905_v14 = vadd.f32 %v904_v13, %v903_v11  ;;  %v906_v15 = vpop.f32.mrb[2].mxu0  ;;  %v925_v16 = vpop.f32.mrb[0].mxu1 }
  0xf8   :  { %v907_v17 = vpop.f32.mrb[3].mxu0  ;;  %v926_v20 = vpop.f32.mrb[1].mxu1 }
  0xf9   :  { %v487_v18 = vadd.f32 %v905_v14, %v815_v12  ;;  %v908_v19 = vadd.f32 %v907_v17, %v906_v15  ;;  %v927_v21 = vadd.f32 %v926_v20, %v925_v16  ;;  %v928_v22 = vpop.f32.mrb[2].mxu1 }
  0xfa   :  { %v929_v24 = vpop.f32.mrb[3].mxu1 }
  0xfb   :  { %v490_v23 = vadd.f32 %v908_v19, %v815_v12  ;;  %v528_v25 = vadd.f32 %v927_v21, %v487_v18  ;;  %v930_v26 = vadd.f32 %v929_v24, %v928_v22 }
  0xfd   :  { %v531_v27 = vadd.f32 %v930_v26, %v490_v23 }
  0xff   :  { %v609_v28 = vpop.f32.mrb[4].mxu1 }
 0x100   :  { %v969_v29 = vpop.f32.mrb[5].mxu1 }
 0x101   :  { %v612_v30 = vpop.f32.mrb[6].mxu1 }
 0x102   :  { %v970_v31 = vpop.f32.mrb[7].mxu1 }
 0x115   :  { %v947_v32 = vpop.f32.mrb[4].mxu0 }
 0x116   :  { %v948_v33 = vpop.f32.mrb[5].mxu0 }
 0x117   :  { %v949_v34 = vadd.f32 %v948_v33, %v947_v32  ;;  %v950_v35 = vpop.f32.mrb[6].mxu0 }
 0x118   :  { %v951_v36 = vpop.f32.mrb[7].mxu0 }
 0x119   :  { %v569_v37 = vadd.f32 %v949_v34, %v528_v25  ;;  %v952_v38 = vadd.f32 %v951_v36, %v950_v35 }
 0x11b   :  { %v610_v39 = vadd.f32 %v609_v28, %v569_v37  ;;  %v572_v40 = vadd.f32 %v952_v38, %v531_v27 }
 0x11d   :  { %v613_v41 = vadd.f32 %v612_v30, %v572_v40  ;;  %v616_v42 = vmax.f32 %v610_v39, 0.0 }
 0x11f   :  { %v617_v44 = vmax.f32 %v613_v41, 0.0 }
 0x121   :  { %v618_v46 = vpack.c.bf16 %v617_v44, %v616_v42 }
 0x123   :  { %980 = vmatmul.mubr.msk.bf16.vlgmr.msra.gmra.mrb[8].mxu1 %vm658_vm2, %v618_v46 }
 0x124   :  { %984 = vmatpush3.bf16.msra.mxu1 %v1053_v45  ;;  %991 = vmatprep.mubr.msk.bf16.mxu1 %vm1082_vm0, %v1081_v43 }
 0x125   :  { %985 = vmatprep.subr.bf16.mxu1 %v1081_v43 }
 0x128   :  { %986 = vmatpush3.bf16.msra.mxu1 %v1054_v47 }
 0x129   :  { %987 = vmatprep.subr.bf16.mxu1 %v1081_v43 }
 0x12c   :  { %988 = vmatpush3.bf16.msra.mxu1 %v1055_v48 }
 0x12d   :  { %989 = vmatprep.subr.bf16.mxu1 %v1081_v43  ;;  %v872_v43 = vld [vmem:[%s1383_s6] ss:$0 sm:$0xff] }
 0x130   :  { %990 = vmatpush3.bf16.msra.mxu1 %v1056_v49 }
 0x1f6   :  { %v696_v51 = vpop.f32.mrb[8].mxu1 }
 0x1f7   :  { %v697_v52 = vadd.f32 %v866_v50, %v696_v51  ;;  %v981_v53 = vpop.f32.mrb[9].mxu1 }
 0x1f8   :  { %v699_v54 = vpop.f32.mrb[10].mxu1 }
 0x1f9   :  { %v700_v55 = vadd.f32 %v866_v50, %v699_v54  ;;  %v982_v56 = vpop.f32.mrb[11].mxu1  ;;  %v703_v57 = vmax.f32 %v697_v52, 0.0 }
 0x1fb   :  { %v704_v58 = vmax.f32 %v700_v55, 0.0 }
 0x1fd   :  { %v705_v59 = vpack.c.bf16 %v704_v58, %v703_v57 }
 0x1ff   :  { %992 = vmatmul.mubr.msk.bf16.vlgmr.msra.gmra.mrb[12].mxu1 %vm658_vm2, %v705_v59 }
 0x2d2   :  { %v782_v60 = vpop.f32.mrb[12].mxu1 }
 0x2d3   :  { %v993_v61 = vpop.f32.mrb[13].mxu1  ;;  %v783_v63 = vadd.f32 %v872_v43, %v782_v60 }
 0x2d4   :  { %v785_v62 = vpop.f32.mrb[14].mxu1 }
 0x2d5   :  { %v786_v0 = vadd.f32 %v872_v43, %v785_v62  ;;  %v994_v1 = vpop.f32.mrb[15].mxu1 }
 0x2d7   :  { %v885_v2 = vpack.c.bf16 %v786_v0, %v783_v63 }
 0x2d9   :  { %886 = vst [vmem:[#allocation2] sm:$0xff] %v885_v2  }
 0x2da   :  { %1068 = shalt.err (!%p1065_p4)
}
 0x2db   :  { %s1069_s9 = scalar_lea.hbm %s1384_s7, 128 }
 0x2dc   :  { %p1070_p5 = scmp.ne.s32.totalorder %s1384_s7, %s1069_s9  ;;  %p1073_p6 = scmp.lt.u32.totalorder %s1069_s9, %s1384_s7 }
 0x2de   :  { %p1075_p7 = pnand %p1073_p6, %p1070_p5 }
 0x2e0   :  { %1078 = shalt.err (!%p1075_p7)
}
 0x2e1   :  { %s1084_s1 = smov 64   ;;  %s1085_s14 = smov 4  }
 0x2e2   :  { %810 = dma.vmem_to_hbm [thread:$0]  %s805_s4, 128, %s1384_s7, [#allocation3], %s1084_s1, %s1084_s1, %s1085_s14  }
 0x2e3   :  { %1079 = dma.done.wait [#allocation3], 128  }
 0x2e4   :  { %1080 = vsyncadd [#allocation3], 4294967168 }
 0x2e5   :  { %814 = vsyncpa [#allocation3], 1 }

</bundles_post_ra>
